<compile_context>
chip_gen: v7x
topology: tpu7x:2x2x1
jax: 0.10.0
libtpu: 0.0.40
codegen_flags: <defaults>
</compile_context>

<pallas_src>
import functools
from math import sqrt

import jax
import jax.numpy as jnp
from jax.experimental import pallas as pl
from jax.experimental.pallas import tpu as pltpu
from jax.scipy.linalg import block_diag


# ---------------------------------------------------------------------------
# in-kernel helpers
# ---------------------------------------------------------------------------
def _mha_ln_slab(x, wqkv_bd, bqkv, wo_bd, bo, gamma, beta, red_m, exp_m, avg_m,
                 S, D, heads):
    """MHA + residual + LayerNorm on a lane-dense slab.

    x: (n, S*D) f32, row = one attention instance, lanes = (position, feature).
    wqkv_bd: (S*D, 3*S*D) bf16 block-diagonal QKV weights; wo_bd: (S*D, S*D).
    red_m:   (S*D, S*heads) f32 0/1 per-head lane-reduction matrix.
    exp_m:   (S*heads, S*D) f32 = red_m.T (probability -> lane expansion).
    avg_m:   (S*D, S*D) f32 per-position averaging matrix (1/D blocks).

    Heavy matmuls feed the MXU in bf16 with f32 accumulation; softmax /
    LayerNorm arithmetic and the structural (0/1, 1/D) matmuls stay in f32.
    """
    n, SD = x.shape
    hd = D // heads
    scale = 1.0 / sqrt(hd)

    qkv = jnp.dot(x.astype(jnp.bfloat16), wqkv_bd,
                  preferred_element_type=jnp.float32) + bqkv            # (n, 3*S*D)
    q = qkv[:, :SD] * scale                                             # 128-aligned slices
    k = qkv[:, SD:2 * SD]
    v = qkv[:, 2 * SD:]

    def lane_roll(z, shift):
        # result[:, l] = z[:, (l + shift) % SD]
        shift = shift % SD
        if shift == 0:
            return z
        return jnp.concatenate([z[:, shift:], z[:, :shift]], axis=1)

    # scores, one slab per key offset δ: s_δ[n, i*heads + h] = <q_i, k_(i+δ)%S>_h
    s_list = []
    for dlt in range(S):
        prod = q * lane_roll(k, dlt * D)                                # (n, S*D) f32
        s_list.append(jnp.dot(prod, red_m,
                              preferred_element_type=jnp.float32))      # (n, S*heads)

    # softmax over the key offset (elementwise across the S slabs)
    m = s_list[0]
    for dlt in range(1, S):
        m = jnp.maximum(m, s_list[dlt])
    p_list = [jnp.exp(s - m) for s in s_list]
    denom = p_list[0]
    for dlt in range(1, S):
        denom = denom + p_list[dlt]
    inv = pl.reciprocal(denom, approx=True)

    # context: ctx = Σ_δ expand(p_δ) * roll(v, δ)
    ctx = None
    for dlt in range(S):
        p_exp = jnp.dot(p_list[dlt] * inv, exp_m,
                        preferred_element_type=jnp.float32)             # (n, S*D)
        term = p_exp * lane_roll(v, dlt * D)
        ctx = term if ctx is None else ctx + term

    attn = jnp.dot(ctx.astype(jnp.bfloat16), wo_bd,
                   preferred_element_type=jnp.float32) + bo             # (n, S*D)

    # residual + per-position LayerNorm (segment stats via averaging matmul)
    y = x + attn
    mu = jnp.dot(y, avg_m, preferred_element_type=jnp.float32)
    yc = y - mu
    var = jnp.dot(yc * yc, avg_m, preferred_element_type=jnp.float32)
    yn = yc * jax.lax.rsqrt(var + 1e-5)
    return yn * gamma + beta


def _fused_kernel(heads, T, V, D,
                  x_ref,
                  e1_ref, be1_ref,
                  wqkv1_ref, bqkv1_ref, wo1_ref, bo1_ref, g1_ref, b1_ref,
                  red1_ref, exp1_ref, avg1_ref,
                  wqkv2_ref, bqkv2_ref, wo2_ref, bo2_ref, g2_ref, b2_ref,
                  red2_ref, exp2_ref, avg2_ref,
                  wpool_ref, bpool_ref,
                  o_ref):
    """One grid step = `bb` batch elements; everything stays in VMEM/vregs."""
    bb = o_ref.shape[0]

    # ---- stage ①: per-variant Linear(1, D) embed ---------------------------
    # TODO(synk): PyTorch would reject bf16 activations against the module's
    # f32 Linear/MHA weights; we interpret the spec as "round the activations
    # to bf16, keep the math in f32 / bf16-MXU with f32 accumulation".
    x2 = x_ref[...].astype(jnp.bfloat16).astype(jnp.float32)            # (bb*T, V)
    a1 = jnp.dot(x2, e1_ref[...],
                 preferred_element_type=jnp.float32) + be1_ref[...]     # (bb*T, V*D)
    a1 = a1.astype(jnp.bfloat16).astype(jnp.float32)

    # ---- stage ①: MHA over V + residual + LayerNorm (slab: rows=(b,t)) ------
    y1 = _mha_ln_slab(a1, wqkv1_ref[...], bqkv1_ref[...], wo1_ref[...],
                      bo1_ref[...], g1_ref[...], b1_ref[...],
                      red1_ref[...], exp1_ref[...], avg1_ref[...],
                      V, D, heads)                                       # (bb*T, V*D)

    # ---- relayout: rows (b,t) x lanes (v,d)  ->  rows (v,b) x lanes (t,d) ----
    # built straight into the lane-dense stage-② slab (no (bb*T,V,D) scratch)
    pieces = []
    for v in range(V):
        y1v = y1[:, v * D:(v + 1) * D].reshape(bb, T, D)                 # (bb, T, D)
        pieces.append(jnp.concatenate([y1v[:, t, :] for t in range(T)],
                                      axis=-1))                          # (bb, T*D)
    a2 = jnp.concatenate(pieces, axis=0)                                 # (V*bb, T*D)

    # ---- stage ②: MHA over T + residual + LayerNorm -------------------------
    y2 = _mha_ln_slab(a2, wqkv2_ref[...], bqkv2_ref[...], wo2_ref[...],
                      bo2_ref[...], g2_ref[...], b2_ref[...],
                      red2_ref[...], exp2_ref[...], avg2_ref[...],
                      T, D, heads)                                       # (V*bb, T*D)

    # ---- stage ③: pool Linear(V*D -> D) as ONE matmul writing the lane-dense
    #      (bb, T*D) output slab (wpool pre-expanded to (V*T*D, T*D)) ---------
    y2cat = jnp.concatenate([y2[v * bb:(v + 1) * bb, :] for v in range(V)],
                            axis=-1)                                     # (bb, V*T*D)
    out = jnp.dot(y2cat.astype(jnp.bfloat16), wpool_ref[...],
                  preferred_element_type=jnp.float32) + bpool_ref[...]   # (bb, T*D)
    o_ref[...] = out.astype(o_ref.dtype)


# ---------------------------------------------------------------------------
# host-side weight preparation (block-diagonal / flattened layouts)
# ---------------------------------------------------------------------------
def _prep_weights(params, V, T, D, heads):
    f32, bf16 = jnp.float32, jnp.bfloat16
    hd = D // heads

    def bd(w, S):
        return block_diag(*([w] * S))

    # embed: E1[v, v*D + d] = we[v, d]  ->  one (n, V) @ (V, V*D) matmul
    we = params['we'].astype(f32)
    e1 = block_diag(*[we[v:v + 1, :] for v in range(V)])                 # (V, V*D)
    be1 = params['be'].astype(f32).reshape(1, V * D)

    # per-head lane-reduction selector: hsel[h*hd+e, h] = 1
    hsel = jnp.repeat(jnp.eye(heads, dtype=f32), hd, axis=0)             # (D, heads)

    def mha_pack(prefix, S):
        wqkv = params['wqkv_' + prefix].astype(f32)                      # (D, 3D)
        wq, wk, wv = wqkv[:, :D], wqkv[:, D:2 * D], wqkv[:, 2 * D:]
        W = jnp.concatenate([bd(wq, S), bd(wk, S), bd(wv, S)],
                            axis=1).astype(bf16)                         # (S*D, 3*S*D)
        bvec = params['bqkv_' + prefix][0].astype(f32)
        bias = jnp.concatenate([jnp.tile(bvec[:D], S),
                                jnp.tile(bvec[D:2 * D], S),
                                jnp.tile(bvec[2 * D:], S)]).reshape(1, 3 * S * D)
        Wo = bd(params['wo_' + prefix].astype(f32), S).astype(bf16)      # (S*D, S*D)
        bo = jnp.tile(params['bo_' + prefix][0].astype(f32), S).reshape(1, S * D)
        g = jnp.tile(params['g_' + prefix][0].astype(f32), S).reshape(1, S * D)
        b = jnp.tile(params['b_' + prefix][0].astype(f32), S).reshape(1, S * D)
        red = bd(hsel, S)                                                # (S*D, S*heads)
        expm = bd(hsel.T, S)                                             # (S*heads, S*D)
        avg = bd(jnp.full((D, D), 1.0 / D, f32), S)                      # (S*D, S*D)
        return (W, bias, Wo, bo, g, b, red, expm, avg)

    s1 = mha_pack('var', V)
    s2 = mha_pack('time', T)

    # pool: Wp[v*T*D + t*D + d, t*D + dd] = wpool[v*D + d, dd]
    wpool = params['wpool'].astype(f32)                                  # (V*D, D)
    Wp = jnp.concatenate([bd(wpool[v * D:(v + 1) * D, :], T) for v in range(V)],
                         axis=0).astype(bf16)                            # (V*T*D, T*D)
    bp = jnp.tile(params['bpool'][0].astype(f32), T).reshape(1, T * D)

    return (e1, be1) + s1 + s2 + (Wp, bp)


# ---------------------------------------------------------------------------
# wrapper
# ---------------------------------------------------------------------------
def variant_temporal_fusion(x, params, *, heads=4):
    B, T, V = x.shape
    D = params['we'].shape[1]
    assert D % heads == 0
    SD1, SD2 = V * D, T * D

    weights = _prep_weights(params, V, T, D, heads)

    # ---- VMEM-aware batch-chunk sizing (counts (8,128)-padded tiles) --------
    try:
        vmem_cap = int(pltpu.get_tpu_info().vmem_capacity_bytes)
    except Exception:
        vmem_cap = 64 * 1024 * 1024            # conservative (v7x-sized) default
    budget = int(vmem_cap * 0.7)
    w_bytes = sum(int(w.size) * w.dtype.itemsize for w in weights)
    fixed = 2 * w_bytes + (2 << 20)            # weight buffers + headroom

    lane = lambda n: -(-n // 128) * 128        # lane padding of a minor dim
    per_b = 4 * (T * (10 * lane(SD1) + (V + 2) * lane(V * heads))   # stage ① live f32 slabs
                 + V * (10 * lane(SD2) + (T + 2) * lane(T * heads))  # stage ② live f32 slabs
                 + 2 * T * 128 + 2 * lane(SD2) + lane(V * SD2))      # x / out blocks + pool concat
    bb_cap = max(1, (budget - fixed) // per_b)

    target = B if B <= 8 else pl.cdiv(B, 2)    # keep ≥2 grid steps for v7x's 2 TCs
    bb = min(bb_cap, target)
    if bb >= B:
        bb = B                                 # single grid step: no sublane constraint
    else:
        bb = (bb // 8) * 8                     # (bb, T*D) out block needs 8-aligned rows
        if bb == 0:
            bb = min(8, B)
    b_pad = pl.cdiv(B, bb) * bb

    if b_pad != B:
        x = jnp.pad(x, ((0, b_pad - B), (0, 0), (0, 0)))
    x_rows = x.reshape(b_pad * T, V).astype(jnp.float32)
    grid = (b_pad // bb,)

    # ---- cost estimate (advisory, rough) -------------------------------------
    n1, n2 = b_pad * T, b_pad * V
    mm_flops = 2 * (n1 * V * SD1
                    + n1 * SD1 * (6 * SD1) + 2 * V * n1 * SD1 * (V * heads)
                    + n2 * SD2 * (6 * SD2) + 2 * T * n2 * SD2 * (T * heads)
                    + b_pad * (V * SD2) * SD2)
    trans = n1 * V * V * heads + n2 * T * T * heads
    bytes_est = int(x_rows.size) * 4 + w_bytes + b_pad * T * D * 4
    cost = pl.CostEstimate(flops=int(mm_flops), transcendentals=int(trans),
                           bytes_accessed=int(bytes_est))

    w0 = lambda i: (0, 0)
    in_specs = [pl.BlockSpec((bb * T, V), lambda i: (i, 0))] + \
               [pl.BlockSpec(w.shape, w0) for w in weights]
    out_specs = pl.BlockSpec((bb, T * D), lambda i: (i, 0))   # lane-dense output slab

    out = pl.pallas_call(
        functools.partial(_fused_kernel, heads, T, V, D),
        out_shape=jax.ShapeDtypeStruct((b_pad, T * D), jnp.float32),
        grid=grid,
        in_specs=in_specs,
        out_specs=out_specs,
        compiler_params=pltpu.CompilerParams(
            dimension_semantics=("parallel",),
            vmem_limit_bytes=int(vmem_cap * 0.8)),
        cost_estimate=cost,
    )(x_rows, *weights)

    return out.reshape(b_pad, T, D)[:B]


# ---------------------------------------------------------------------------
# pure-JAX reference (f32 math, bf16 rounding at the embed) for checking
# ---------------------------------------------------------------------------
def _ref_mha_layernorm(x, wqkv, bqkv, wo, bo, gamma, beta, heads):
    n, S, D = x.shape
    hd = D // heads
    qkv = x @ wqkv + bqkv
    q, k, v = qkv[..., :D], qkv[..., D:2 * D], qkv[..., 2 * D:]
    q = q.reshape(n, S, heads, hd).transpose(0, 2, 1, 3)
    k = k.reshape(n, S, heads, hd).transpose(0, 2, 1, 3)
    v = v.reshape(n, S, heads, hd).transpose(0, 2, 1, 3)
    s = jnp.einsum('nhqe,nhke->nhqk', q, k) / sqrt(hd)
    p = jax.nn.softmax(s, axis=-1)
    ctx = jnp.einsum('nhqk,nhke->nhqe', p, v).transpose(0, 2, 1, 3).reshape(n, S, D)
    y = x + (ctx @ wo + bo)
    mu = y.mean(-1, keepdims=True)
    var = ((y - mu) ** 2).mean(-1, keepdims=True)
    return (y - mu) / jnp.sqrt(var + 1e-5) * gamma + beta


def variant_temporal_fusion_ref(x, params, *, heads=4):
    B, T, V = x.shape
    D = params['we'].shape[1]
    xb = x.astype(jnp.bfloat16).astype(jnp.float32)
    toks = xb[..., None] * params['we'][None, None] + params['be'][None, None]
    toks = toks.astype(jnp.bfloat16).astype(jnp.float32)           # (B, T, V, D)
    y1 = _ref_mha_layernorm(toks.reshape(B * T, V, D),
                            params['wqkv_var'], params['bqkv_var'][0],
                            params['wo_var'], params['bo_var'][0],
                            params['g_var'][0], params['b_var'][0], heads)
    x2 = y1.reshape(B, T, V, D).transpose(0, 2, 1, 3).reshape(B * V, T, D)
    y2 = _ref_mha_layernorm(x2,
                            params['wqkv_time'], params['bqkv_time'][0],
                            params['wo_time'], params['bo_time'][0],
                            params['g_time'][0], params['b_time'][0], heads)
    t_flat = y2.reshape(B, V, T, D).transpose(0, 2, 1, 3).reshape(B * T, V * D)
    out = t_flat @ params['wpool'] + params['bpool'][0]
    return out.reshape(B, T, D)


# ---------------------------------------------------------------------------
# synthetic parameters
# ---------------------------------------------------------------------------
def init_params(key, variants, d_model):
    V, D = variants, d_model
    ks = jax.random.split(key, 12)
    s = 0.05
    return {
        'we':        jax.random.normal(ks[0], (V, D), jnp.float32) * s,
        'be':        jax.random.normal(ks[1], (V, D), jnp.float32) * s,
        'wqkv_var':  jax.random.normal(ks[2], (D, 3 * D), jnp.float32) * s,
        'bqkv_var':  jax.random.normal(ks[3], (1, 3 * D), jnp.float32) * s,
        'wo_var':    jax.random.normal(ks[4], (D, D), jnp.float32) * s,
        'bo_var':    jax.random.normal(ks[5], (1, D), jnp.float32) * s,
        'g_var':     jnp.ones((1, D), jnp.float32),
        'b_var':     jnp.zeros((1, D), jnp.float32),
        'wqkv_time': jax.random.normal(ks[6], (D, 3 * D), jnp.float32) * s,
        'bqkv_time': jax.random.normal(ks[7], (1, 3 * D), jnp.float32) * s,
        'wo_time':   jax.random.normal(ks[8], (D, D), jnp.float32) * s,
        'bo_time':   jax.random.normal(ks[9], (1, D), jnp.float32) * s,
        'g_time':    jnp.ones((1, D), jnp.float32),
        'b_time':    jnp.zeros((1, D), jnp.float32),
        'wpool':     jax.random.normal(ks[10], (V * D, D), jnp.float32) * s,
        'bpool':     jax.random.normal(ks[11], (1, D), jnp.float32) * s,
    }


if __name__ == "__main__":
    B, T, V, D, H = 2, 8, 4, 32, 4          # variants=4, d_model=32, heads=4
    key = jax.random.PRNGKey(0)
    kx, kp = jax.random.split(key)
    x = jax.random.normal(kx, (B, T, V), jnp.float32)
    params = init_params(kp, V, D)

    fn = jax.jit(functools.partial(variant_temporal_fusion, heads=H))
    out = jax.block_until_ready(fn(x, params))
    assert out.shape == (B, T, D), out.shape
    assert bool(jnp.all(jnp.isfinite(out)))

    # compare against the pure-JAX f32 reference (bf16 MXU matmuls + approx
    # reciprocal are the only deviations -> generous tolerance)
    ref = variant_temporal_fusion_ref(x, params, heads=H)
    err = float(jnp.max(jnp.abs(out - ref)))
    assert err < 5e-2, f"max abs err {err}"
    print("KERNEL_OK")
</pallas_src>

<mosaic_0001>
module attributes {stable_mosaic.version = 11 : i64} {
  func.func @_fused_kernel(%arg0: i32, %arg1: memref<16x4xf32, #tpu.memory_space<vmem>>, %arg2: memref<4x128xf32, #tpu.memory_space<vmem>>, %arg3: memref<1x128xf32, #tpu.memory_space<vmem>>, %arg4: memref<128x384xbf16, #tpu.memory_space<vmem>>, %arg5: memref<1x384xf32, #tpu.memory_space<vmem>>, %arg6: memref<128x128xbf16, #tpu.memory_space<vmem>>, %arg7: memref<1x128xf32, #tpu.memory_space<vmem>>, %arg8: memref<1x128xf32, #tpu.memory_space<vmem>>, %arg9: memref<1x128xf32, #tpu.memory_space<vmem>>, %arg10: memref<128x16xf32, #tpu.memory_space<vmem>>, %arg11: memref<16x128xf32, #tpu.memory_space<vmem>>, %arg12: memref<128x128xf32, #tpu.memory_space<vmem>>, %arg13: memref<256x768xbf16, #tpu.memory_space<vmem>>, %arg14: memref<1x768xf32, #tpu.memory_space<vmem>>, %arg15: memref<256x256xbf16, #tpu.memory_space<vmem>>, %arg16: memref<1x256xf32, #tpu.memory_space<vmem>>, %arg17: memref<1x256xf32, #tpu.memory_space<vmem>>, %arg18: memref<1x256xf32, #tpu.memory_space<vmem>>, %arg19: memref<256x32xf32, #tpu.memory_space<vmem>>, %arg20: memref<32x256xf32, #tpu.memory_space<vmem>>, %arg21: memref<256x256xf32, #tpu.memory_space<vmem>>, %arg22: memref<1024x256xbf16, #tpu.memory_space<vmem>>, %arg23: memref<1x256xf32, #tpu.memory_space<vmem>>, %arg24: memref<2x256xf32, #tpu.memory_space<vmem>>) attributes {dimension_semantics = [#tpu.dimension_semantics<parallel>], iteration_bounds = array<i64: 1>, scalar_prefetch = 0 : i64, scratch_operands = 0 : i64, tpu.core_type = #tpu.core_type<tc>, window_params = [{transform_indices = @transform_0, window_bounds = array<i64: 16, 4>}, {pipeline_mode = #tpu.pipeline_mode<synchronous>, transform_indices = @transform_1, window_bounds = array<i64: 4, 128>}, {pipeline_mode = #tpu.pipeline_mode<synchronous>, transform_indices = @transform_2, window_bounds = array<i64: 1, 128>}, {pipeline_mode = #tpu.pipeline_mode<synchronous>, transform_indices = @transform_3, window_bounds = array<i64: 128, 384>}, {pipeline_mode = #tpu.pipeline_mode<synchronous>, transform_indices = @transform_4, window_bounds = array<i64: 1, 384>}, {pipeline_mode = #tpu.pipeline_mode<synchronous>, transform_indices = @transform_5, window_bounds = array<i64: 128, 128>}, {pipeline_mode = #tpu.pipeline_mode<synchronous>, transform_indices = @transform_6, window_bounds = array<i64: 1, 128>}, {pipeline_mode = #tpu.pipeline_mode<synchronous>, transform_indices = @transform_7, window_bounds = array<i64: 1, 128>}, {pipeline_mode = #tpu.pipeline_mode<synchronous>, transform_indices = @transform_8, window_bounds = array<i64: 1, 128>}, {pipeline_mode = #tpu.pipeline_mode<synchronous>, transform_indices = @transform_9, window_bounds = array<i64: 128, 16>}, {pipeline_mode = #tpu.pipeline_mode<synchronous>, transform_indices = @transform_10, window_bounds = array<i64: 16, 128>}, {pipeline_mode = #tpu.pipeline_mode<synchronous>, transform_indices = @transform_11, window_bounds = array<i64: 128, 128>}, {pipeline_mode = #tpu.pipeline_mode<synchronous>, transform_indices = @transform_12, window_bounds = array<i64: 256, 768>}, {pipeline_mode = #tpu.pipeline_mode<synchronous>, transform_indices = @transform_13, window_bounds = array<i64: 1, 768>}, {pipeline_mode = #tpu.pipeline_mode<synchronous>, transform_indices = @transform_14, window_bounds = array<i64: 256, 256>}, {pipeline_mode = #tpu.pipeline_mode<synchronous>, transform_indices = @transform_15, window_bounds = array<i64: 1, 256>}, {pipeline_mode = #tpu.pipeline_mode<synchronous>, transform_indices = @transform_16, window_bounds = array<i64: 1, 256>}, {pipeline_mode = #tpu.pipeline_mode<synchronous>, transform_indices = @transform_17, window_bounds = array<i64: 1, 256>}, {pipeline_mode = #tpu.pipeline_mode<synchronous>, transform_indices = @transform_18, window_bounds = array<i64: 256, 32>}, {pipeline_mode = #tpu.pipeline_mode<synchronous>, transform_indices = @transform_19, window_bounds = array<i64: 32, 256>}, {pipeline_mode = #tpu.pipeline_mode<synchronous>, transform_indices = @transform_20, window_bounds = array<i64: 256, 256>}, {pipeline_mode = #tpu.pipeline_mode<synchronous>, transform_indices = @transform_21, window_bounds = array<i64: 1024, 256>}, {pipeline_mode = #tpu.pipeline_mode<synchronous>, transform_indices = @transform_22, window_bounds = array<i64: 1, 256>}, {transform_indices = @transform_23, window_bounds = array<i64: 2, 256>}]} {
    %c0 = arith.constant 0 : index
    %c0_0 = arith.constant 0 : index
    %0 = vector.load %arg1[%c0, %c0_0] : memref<16x4xf32, #tpu.memory_space<vmem>>, vector<16x4xf32>
    %1 = arith.truncf %0 : vector<16x4xf32> to vector<16x4xbf16>
    %2 = arith.extf %1 : vector<16x4xbf16> to vector<16x4xf32>
    %c0_1 = arith.constant 0 : index
    %c0_2 = arith.constant 0 : index
    %3 = vector.load %arg2[%c0_1, %c0_2] : memref<4x128xf32, #tpu.memory_space<vmem>>, vector<4x128xf32>
    %cst = arith.constant dense<0.000000e+00> : vector<16x128xf32>
    %4 = tpu.matmul %2, %3, %cst {dimension_numbers = #tpu.dot_dimension_numbers<[1], [0], [0], [1], [0, 0, 1, 1], [], []>} : vector<16x4xf32>, vector<4x128xf32>, vector<16x128xf32> -> vector<16x128xf32>
    %c0_3 = arith.constant 0 : index
    %c0_4 = arith.constant 0 : index
    %5 = vector.load %arg3[%c0_3, %c0_4] : memref<1x128xf32, #tpu.memory_space<vmem>>, vector<1x128xf32>
    %6 = vector.broadcast %5 : vector<1x128xf32> to vector<16x128xf32>
    %7 = arith.addf %4, %6 : vector<16x128xf32>
    %8 = arith.truncf %7 : vector<16x128xf32> to vector<16x128xbf16>
    %9 = arith.extf %8 : vector<16x128xbf16> to vector<16x128xf32>
    %c0_5 = arith.constant 0 : index
    %c0_6 = arith.constant 0 : index
    %10 = vector.load %arg4[%c0_5, %c0_6] : memref<128x384xbf16, #tpu.memory_space<vmem>>, vector<128x384xbf16>
    %c0_7 = arith.constant 0 : index
    %c0_8 = arith.constant 0 : index
    %11 = vector.load %arg5[%c0_7, %c0_8] : memref<1x384xf32, #tpu.memory_space<vmem>>, vector<1x384xf32>
    %c0_9 = arith.constant 0 : index
    %c0_10 = arith.constant 0 : index
    %12 = vector.load %arg6[%c0_9, %c0_10] : memref<128x128xbf16, #tpu.memory_space<vmem>>, vector<128x128xbf16>
    %c0_11 = arith.constant 0 : index
    %c0_12 = arith.constant 0 : index
    %13 = vector.load %arg7[%c0_11, %c0_12] : memref<1x128xf32, #tpu.memory_space<vmem>>, vector<1x128xf32>
    %c0_13 = arith.constant 0 : index
    %c0_14 = arith.constant 0 : index
    %14 = vector.load %arg8[%c0_13, %c0_14] : memref<1x128xf32, #tpu.memory_space<vmem>>, vector<1x128xf32>
    %c0_15 = arith.constant 0 : index
    %c0_16 = arith.constant 0 : index
    %15 = vector.load %arg9[%c0_15, %c0_16] : memref<1x128xf32, #tpu.memory_space<vmem>>, vector<1x128xf32>
    %c0_17 = arith.constant 0 : index
    %c0_18 = arith.constant 0 : index
    %16 = vector.load %arg10[%c0_17, %c0_18] : memref<128x16xf32, #tpu.memory_space<vmem>>, vector<128x16xf32>
    %c0_19 = arith.constant 0 : index
    %c0_20 = arith.constant 0 : index
    %17 = vector.load %arg11[%c0_19, %c0_20] : memref<16x128xf32, #tpu.memory_space<vmem>>, vector<16x128xf32>
    %c0_21 = arith.constant 0 : index
    %c0_22 = arith.constant 0 : index
    %18 = vector.load %arg12[%c0_21, %c0_22] : memref<128x128xf32, #tpu.memory_space<vmem>>, vector<128x128xf32>
    %19 = arith.truncf %9 : vector<16x128xf32> to vector<16x128xbf16>
    %cst_23 = arith.constant dense<0.000000e+00> : vector<16x384xf32>
    %20 = tpu.matmul %19, %10, %cst_23 {dimension_numbers = #tpu.dot_dimension_numbers<[1], [0], [0], [1], [0, 0, 1, 1], [], []>} : vector<16x128xbf16>, vector<128x384xbf16>, vector<16x384xf32> -> vector<16x384xf32>
    %21 = vector.broadcast %11 : vector<1x384xf32> to vector<16x384xf32>
    %22 = arith.addf %20, %21 : vector<16x384xf32>
    %23 = vector.extract_strided_slice %22 {offsets = [0, 0], sizes = [16, 128], strides = [1, 1]} : vector<16x384xf32> to vector<16x128xf32>
    %cst_24 = arith.constant 0.353553385 : f32
    %24 = vector.broadcast %cst_24 : f32 to vector<16x128xf32>
    %25 = arith.mulf %23, %24 : vector<16x128xf32>
    %26 = vector.extract_strided_slice %22 {offsets = [0, 128], sizes = [16, 128], strides = [1, 1]} : vector<16x384xf32> to vector<16x128xf32>
    %27 = vector.extract_strided_slice %22 {offsets = [0, 256], sizes = [16, 128], strides = [1, 1]} : vector<16x384xf32> to vector<16x128xf32>
    %28 = arith.mulf %25, %26 : vector<16x128xf32>
    %cst_25 = arith.constant dense<0.000000e+00> : vector<16x16xf32>
    %29 = tpu.matmul %28, %16, %cst_25 {dimension_numbers = #tpu.dot_dimension_numbers<[1], [0], [0], [1], [0, 0, 1, 1], [], []>} : vector<16x128xf32>, vector<128x16xf32>, vector<16x16xf32> -> vector<16x16xf32>
    %30 = vector.extract_strided_slice %26 {offsets = [0, 32], sizes = [16, 96], strides = [1, 1]} : vector<16x128xf32> to vector<16x96xf32>
    %31 = vector.extract_strided_slice %26 {offsets = [0, 0], sizes = [16, 32], strides = [1, 1]} : vector<16x128xf32> to vector<16x32xf32>
    %32 = tpu.concatenate %30, %31 in 1 : vector<16x96xf32>, vector<16x32xf32> -> vector<16x128xf32>
    %33 = arith.mulf %25, %32 : vector<16x128xf32>
    %cst_26 = arith.constant dense<0.000000e+00> : vector<16x16xf32>
    %34 = tpu.matmul %33, %16, %cst_26 {dimension_numbers = #tpu.dot_dimension_numbers<[1], [0], [0], [1], [0, 0, 1, 1], [], []>} : vector<16x128xf32>, vector<128x16xf32>, vector<16x16xf32> -> vector<16x16xf32>
    %35 = vector.extract_strided_slice %26 {offsets = [0, 64], sizes = [16, 64], strides = [1, 1]} : vector<16x128xf32> to vector<16x64xf32>
    %36 = vector.extract_strided_slice %26 {offsets = [0, 0], sizes = [16, 64], strides = [1, 1]} : vector<16x128xf32> to vector<16x64xf32>
    %37 = tpu.concatenate %35, %36 in 1 : vector<16x64xf32>, vector<16x64xf32> -> vector<16x128xf32>
    %38 = arith.mulf %25, %37 : vector<16x128xf32>
    %cst_27 = arith.constant dense<0.000000e+00> : vector<16x16xf32>
    %39 = tpu.matmul %38, %16, %cst_27 {dimension_numbers = #tpu.dot_dimension_numbers<[1], [0], [0], [1], [0, 0, 1, 1], [], []>} : vector<16x128xf32>, vector<128x16xf32>, vector<16x16xf32> -> vector<16x16xf32>
    %40 = vector.extract_strided_slice %26 {offsets = [0, 96], sizes = [16, 32], strides = [1, 1]} : vector<16x128xf32> to vector<16x32xf32>
    %41 = vector.extract_strided_slice %26 {offsets = [0, 0], sizes = [16, 96], strides = [1, 1]} : vector<16x128xf32> to vector<16x96xf32>
    %42 = tpu.concatenate %40, %41 in 1 : vector<16x32xf32>, vector<16x96xf32> -> vector<16x128xf32>
    %43 = arith.mulf %25, %42 : vector<16x128xf32>
    %cst_28 = arith.constant dense<0.000000e+00> : vector<16x16xf32>
    %44 = tpu.matmul %43, %16, %cst_28 {dimension_numbers = #tpu.dot_dimension_numbers<[1], [0], [0], [1], [0, 0, 1, 1], [], []>} : vector<16x128xf32>, vector<128x16xf32>, vector<16x16xf32> -> vector<16x16xf32>
    %45 = arith.maximumf %29, %34 : vector<16x16xf32>
    %46 = arith.maximumf %45, %39 : vector<16x16xf32>
    %47 = arith.maximumf %46, %44 : vector<16x16xf32>
    %48 = arith.subf %29, %47 : vector<16x16xf32>
    %49 = math.exp %48 : vector<16x16xf32>
    %50 = arith.subf %34, %47 : vector<16x16xf32>
    %51 = math.exp %50 : vector<16x16xf32>
    %52 = arith.subf %39, %47 : vector<16x16xf32>
    %53 = math.exp %52 : vector<16x16xf32>
    %54 = arith.subf %44, %47 : vector<16x16xf32>
    %55 = math.exp %54 : vector<16x16xf32>
    %56 = arith.addf %49, %51 : vector<16x16xf32>
    %57 = arith.addf %56, %53 : vector<16x16xf32>
    %58 = arith.addf %57, %55 : vector<16x16xf32>
    %59 = tpu.reciprocal %58 {approx = true} : vector<16x16xf32> -> vector<16x16xf32>
    %60 = arith.mulf %49, %59 : vector<16x16xf32>
    %cst_29 = arith.constant dense<0.000000e+00> : vector<16x128xf32>
    %61 = tpu.matmul %60, %17, %cst_29 {dimension_numbers = #tpu.dot_dimension_numbers<[1], [0], [0], [1], [0, 0, 1, 1], [], []>} : vector<16x16xf32>, vector<16x128xf32>, vector<16x128xf32> -> vector<16x128xf32>
    %62 = arith.mulf %61, %27 : vector<16x128xf32>
    %63 = arith.mulf %51, %59 : vector<16x16xf32>
    %cst_30 = arith.constant dense<0.000000e+00> : vector<16x128xf32>
    %64 = tpu.matmul %63, %17, %cst_30 {dimension_numbers = #tpu.dot_dimension_numbers<[1], [0], [0], [1], [0, 0, 1, 1], [], []>} : vector<16x16xf32>, vector<16x128xf32>, vector<16x128xf32> -> vector<16x128xf32>
    %65 = vector.extract_strided_slice %27 {offsets = [0, 32], sizes = [16, 96], strides = [1, 1]} : vector<16x128xf32> to vector<16x96xf32>
    %66 = vector.extract_strided_slice %27 {offsets = [0, 0], sizes = [16, 32], strides = [1, 1]} : vector<16x128xf32> to vector<16x32xf32>
    %67 = tpu.concatenate %65, %66 in 1 : vector<16x96xf32>, vector<16x32xf32> -> vector<16x128xf32>
    %68 = arith.mulf %64, %67 : vector<16x128xf32>
    %69 = arith.addf %62, %68 : vector<16x128xf32>
    %70 = arith.mulf %53, %59 : vector<16x16xf32>
    %cst_31 = arith.constant dense<0.000000e+00> : vector<16x128xf32>
    %71 = tpu.matmul %70, %17, %cst_31 {dimension_numbers = #tpu.dot_dimension_numbers<[1], [0], [0], [1], [0, 0, 1, 1], [], []>} : vector<16x16xf32>, vector<16x128xf32>, vector<16x128xf32> -> vector<16x128xf32>
    %72 = vector.extract_strided_slice %27 {offsets = [0, 64], sizes = [16, 64], strides = [1, 1]} : vector<16x128xf32> to vector<16x64xf32>
    %73 = vector.extract_strided_slice %27 {offsets = [0, 0], sizes = [16, 64], strides = [1, 1]} : vector<16x128xf32> to vector<16x64xf32>
    %74 = tpu.concatenate %72, %73 in 1 : vector<16x64xf32>, vector<16x64xf32> -> vector<16x128xf32>
    %75 = arith.mulf %71, %74 : vector<16x128xf32>
    %76 = arith.addf %69, %75 : vector<16x128xf32>
    %77 = arith.mulf %55, %59 : vector<16x16xf32>
    %cst_32 = arith.constant dense<0.000000e+00> : vector<16x128xf32>
    %78 = tpu.matmul %77, %17, %cst_32 {dimension_numbers = #tpu.dot_dimension_numbers<[1], [0], [0], [1], [0, 0, 1, 1], [], []>} : vector<16x16xf32>, vector<16x128xf32>, vector<16x128xf32> -> vector<16x128xf32>
    %79 = vector.extract_strided_slice %27 {offsets = [0, 96], sizes = [16, 32], strides = [1, 1]} : vector<16x128xf32> to vector<16x32xf32>
    %80 = vector.extract_strided_slice %27 {offsets = [0, 0], sizes = [16, 96], strides = [1, 1]} : vector<16x128xf32> to vector<16x96xf32>
    %81 = tpu.concatenate %79, %80 in 1 : vector<16x32xf32>, vector<16x96xf32> -> vector<16x128xf32>
    %82 = arith.mulf %78, %81 : vector<16x128xf32>
    %83 = arith.addf %76, %82 : vector<16x128xf32>
    %84 = arith.truncf %83 : vector<16x128xf32> to vector<16x128xbf16>
    %cst_33 = arith.constant dense<0.000000e+00> : vector<16x128xf32>
    %85 = tpu.matmul %84, %12, %cst_33 {dimension_numbers = #tpu.dot_dimension_numbers<[1], [0], [0], [1], [0, 0, 1, 1], [], []>} : vector<16x128xbf16>, vector<128x128xbf16>, vector<16x128xf32> -> vector<16x128xf32>
    %86 = vector.broadcast %13 : vector<1x128xf32> to vector<16x128xf32>
    %87 = arith.addf %85, %86 : vector<16x128xf32>
    %88 = arith.addf %9, %87 : vector<16x128xf32>
    %cst_34 = arith.constant dense<0.000000e+00> : vector<16x128xf32>
    %89 = tpu.matmul %88, %18, %cst_34 {dimension_numbers = #tpu.dot_dimension_numbers<[1], [0], [0], [1], [0, 0, 1, 1], [], []>} : vector<16x128xf32>, vector<128x128xf32>, vector<16x128xf32> -> vector<16x128xf32>
    %90 = arith.subf %88, %89 : vector<16x128xf32>
    %91 = arith.mulf %90, %90 : vector<16x128xf32>
    %cst_35 = arith.constant dense<0.000000e+00> : vector<16x128xf32>
    %92 = tpu.matmul %91, %18, %cst_35 {dimension_numbers = #tpu.dot_dimension_numbers<[1], [0], [0], [1], [0, 0, 1, 1], [], []>} : vector<16x128xf32>, vector<128x128xf32>, vector<16x128xf32> -> vector<16x128xf32>
    %cst_36 = arith.constant 9.99999974E-6 : f32
    %93 = vector.broadcast %cst_36 : f32 to vector<16x128xf32>
    %94 = arith.addf %92, %93 : vector<16x128xf32>
    %95 = math.rsqrt %94 : vector<16x128xf32>
    %96 = arith.mulf %90, %95 : vector<16x128xf32>
    %97 = vector.broadcast %14 : vector<1x128xf32> to vector<16x128xf32>
    %98 = arith.mulf %96, %97 : vector<16x128xf32>
    %99 = vector.broadcast %15 : vector<1x128xf32> to vector<16x128xf32>
    %100 = arith.addf %98, %99 : vector<16x128xf32>
    %101 = vector.extract_strided_slice %100 {offsets = [0, 0], sizes = [16, 32], strides = [1, 1]} : vector<16x128xf32> to vector<16x32xf32>
    %102 = vector.shape_cast %101 : vector<16x32xf32> to vector<2x8x32xf32>
    %103 = vector.extract_strided_slice %102 {offsets = [0, 0, 0], sizes = [2, 1, 32], strides = [1, 1, 1]} : vector<2x8x32xf32> to vector<2x1x32xf32>
    %104 = vector.shape_cast %103 : vector<2x1x32xf32> to vector<2x32xf32>
    %105 = vector.extract_strided_slice %102 {offsets = [0, 1, 0], sizes = [2, 1, 32], strides = [1, 1, 1]} : vector<2x8x32xf32> to vector<2x1x32xf32>
    %106 = vector.shape_cast %105 : vector<2x1x32xf32> to vector<2x32xf32>
    %107 = vector.extract_strided_slice %102 {offsets = [0, 2, 0], sizes = [2, 1, 32], strides = [1, 1, 1]} : vector<2x8x32xf32> to vector<2x1x32xf32>
    %108 = vector.shape_cast %107 : vector<2x1x32xf32> to vector<2x32xf32>
    %109 = vector.extract_strided_slice %102 {offsets = [0, 3, 0], sizes = [2, 1, 32], strides = [1, 1, 1]} : vector<2x8x32xf32> to vector<2x1x32xf32>
    %110 = vector.shape_cast %109 : vector<2x1x32xf32> to vector<2x32xf32>
    %111 = vector.extract_strided_slice %102 {offsets = [0, 4, 0], sizes = [2, 1, 32], strides = [1, 1, 1]} : vector<2x8x32xf32> to vector<2x1x32xf32>
    %112 = vector.shape_cast %111 : vector<2x1x32xf32> to vector<2x32xf32>
    %113 = vector.extract_strided_slice %102 {offsets = [0, 5, 0], sizes = [2, 1, 32], strides = [1, 1, 1]} : vector<2x8x32xf32> to vector<2x1x32xf32>
    %114 = vector.shape_cast %113 : vector<2x1x32xf32> to vector<2x32xf32>
    %115 = vector.extract_strided_slice %102 {offsets = [0, 6, 0], sizes = [2, 1, 32], strides = [1, 1, 1]} : vector<2x8x32xf32> to vector<2x1x32xf32>
    %116 = vector.shape_cast %115 : vector<2x1x32xf32> to vector<2x32xf32>
    %117 = vector.extract_strided_slice %102 {offsets = [0, 7, 0], sizes = [2, 1, 32], strides = [1, 1, 1]} : vector<2x8x32xf32> to vector<2x1x32xf32>
    %118 = vector.shape_cast %117 : vector<2x1x32xf32> to vector<2x32xf32>
    %119 = tpu.concatenate %104, %106, %108, %110, %112, %114, %116, %118 in 1 : vector<2x32xf32>, vector<2x32xf32>, vector<2x32xf32>, vector<2x32xf32>, vector<2x32xf32>, vector<2x32xf32>, vector<2x32xf32>, vector<2x32xf32> -> vector<2x256xf32>
    %120 = vector.extract_strided_slice %100 {offsets = [0, 32], sizes = [16, 32], strides = [1, 1]} : vector<16x128xf32> to vector<16x32xf32>
    %121 = vector.shape_cast %120 : vector<16x32xf32> to vector<2x8x32xf32>
    %122 = vector.extract_strided_slice %121 {offsets = [0, 0, 0], sizes = [2, 1, 32], strides = [1, 1, 1]} : vector<2x8x32xf32> to vector<2x1x32xf32>
    %123 = vector.shape_cast %122 : vector<2x1x32xf32> to vector<2x32xf32>
    %124 = vector.extract_strided_slice %121 {offsets = [0, 1, 0], sizes = [2, 1, 32], strides = [1, 1, 1]} : vector<2x8x32xf32> to vector<2x1x32xf32>
    %125 = vector.shape_cast %124 : vector<2x1x32xf32> to vector<2x32xf32>
    %126 = vector.extract_strided_slice %121 {offsets = [0, 2, 0], sizes = [2, 1, 32], strides = [1, 1, 1]} : vector<2x8x32xf32> to vector<2x1x32xf32>
    %127 = vector.shape_cast %126 : vector<2x1x32xf32> to vector<2x32xf32>
    %128 = vector.extract_strided_slice %121 {offsets = [0, 3, 0], sizes = [2, 1, 32], strides = [1, 1, 1]} : vector<2x8x32xf32> to vector<2x1x32xf32>
    %129 = vector.shape_cast %128 : vector<2x1x32xf32> to vector<2x32xf32>
    %130 = vector.extract_strided_slice %121 {offsets = [0, 4, 0], sizes = [2, 1, 32], strides = [1, 1, 1]} : vector<2x8x32xf32> to vector<2x1x32xf32>
    %131 = vector.shape_cast %130 : vector<2x1x32xf32> to vector<2x32xf32>
    %132 = vector.extract_strided_slice %121 {offsets = [0, 5, 0], sizes = [2, 1, 32], strides = [1, 1, 1]} : vector<2x8x32xf32> to vector<2x1x32xf32>
    %133 = vector.shape_cast %132 : vector<2x1x32xf32> to vector<2x32xf32>
    %134 = vector.extract_strided_slice %121 {offsets = [0, 6, 0], sizes = [2, 1, 32], strides = [1, 1, 1]} : vector<2x8x32xf32> to vector<2x1x32xf32>
    %135 = vector.shape_cast %134 : vector<2x1x32xf32> to vector<2x32xf32>
    %136 = vector.extract_strided_slice %121 {offsets = [0, 7, 0], sizes = [2, 1, 32], strides = [1, 1, 1]} : vector<2x8x32xf32> to vector<2x1x32xf32>
    %137 = vector.shape_cast %136 : vector<2x1x32xf32> to vector<2x32xf32>
    %138 = tpu.concatenate %123, %125, %127, %129, %131, %133, %135, %137 in 1 : vector<2x32xf32>, vector<2x32xf32>, vector<2x32xf32>, vector<2x32xf32>, vector<2x32xf32>, vector<2x32xf32>, vector<2x32xf32>, vector<2x32xf32> -> vector<2x256xf32>
    %139 = vector.extract_strided_slice %100 {offsets = [0, 64], sizes = [16, 32], strides = [1, 1]} : vector<16x128xf32> to vector<16x32xf32>
    %140 = vector.shape_cast %139 : vector<16x32xf32> to vector<2x8x32xf32>
    %141 = vector.extract_strided_slice %140 {offsets = [0, 0, 0], sizes = [2, 1, 32], strides = [1, 1, 1]} : vector<2x8x32xf32> to vector<2x1x32xf32>
    %142 = vector.shape_cast %141 : vector<2x1x32xf32> to vector<2x32xf32>
    %143 = vector.extract_strided_slice %140 {offsets = [0, 1, 0], sizes = [2, 1, 32], strides = [1, 1, 1]} : vector<2x8x32xf32> to vector<2x1x32xf32>
    %144 = vector.shape_cast %143 : vector<2x1x32xf32> to vector<2x32xf32>
    %145 = vector.extract_strided_slice %140 {offsets = [0, 2, 0], sizes = [2, 1, 32], strides = [1, 1, 1]} : vector<2x8x32xf32> to vector<2x1x32xf32>
    %146 = vector.shape_cast %145 : vector<2x1x32xf32> to vector<2x32xf32>
    %147 = vector.extract_strided_slice %140 {offsets = [0, 3, 0], sizes = [2, 1, 32], strides = [1, 1, 1]} : vector<2x8x32xf32> to vector<2x1x32xf32>
    %148 = vector.shape_cast %147 : vector<2x1x32xf32> to vector<2x32xf32>
    %149 = vector.extract_strided_slice %140 {offsets = [0, 4, 0], sizes = [2, 1, 32], strides = [1, 1, 1]} : vector<2x8x32xf32> to vector<2x1x32xf32>
    %150 = vector.shape_cast %149 : vector<2x1x32xf32> to vector<2x32xf32>
    %151 = vector.extract_strided_slice %140 {offsets = [0, 5, 0], sizes = [2, 1, 32], strides = [1, 1, 1]} : vector<2x8x32xf32> to vector<2x1x32xf32>
    %152 = vector.shape_cast %151 : vector<2x1x32xf32> to vector<2x32xf32>
    %153 = vector.extract_strided_slice %140 {offsets = [0, 6, 0], sizes = [2, 1, 32], strides = [1, 1, 1]} : vector<2x8x32xf32> to vector<2x1x32xf32>
    %154 = vector.shape_cast %153 : vector<2x1x32xf32> to vector<2x32xf32>
    %155 = vector.extract_strided_slice %140 {offsets = [0, 7, 0], sizes = [2, 1, 32], strides = [1, 1, 1]} : vector<2x8x32xf32> to vector<2x1x32xf32>
    %156 = vector.shape_cast %155 : vector<2x1x32xf32> to vector<2x32xf32>
    %157 = tpu.concatenate %142, %144, %146, %148, %150, %152, %154, %156 in 1 : vector<2x32xf32>, vector<2x32xf32>, vector<2x32xf32>, vector<2x32xf32>, vector<2x32xf32>, vector<2x32xf32>, vector<2x32xf32>, vector<2x32xf32> -> vector<2x256xf32>
    %158 = vector.extract_strided_slice %100 {offsets = [0, 96], sizes = [16, 32], strides = [1, 1]} : vector<16x128xf32> to vector<16x32xf32>
    %159 = vector.shape_cast %158 : vector<16x32xf32> to vector<2x8x32xf32>
    %160 = vector.extract_strided_slice %159 {offsets = [0, 0, 0], sizes = [2, 1, 32], strides = [1, 1, 1]} : vector<2x8x32xf32> to vector<2x1x32xf32>
    %161 = vector.shape_cast %160 : vector<2x1x32xf32> to vector<2x32xf32>
    %162 = vector.extract_strided_slice %159 {offsets = [0, 1, 0], sizes = [2, 1, 32], strides = [1, 1, 1]} : vector<2x8x32xf32> to vector<2x1x32xf32>
    %163 = vector.shape_cast %162 : vector<2x1x32xf32> to vector<2x32xf32>
    %164 = vector.extract_strided_slice %159 {offsets = [0, 2, 0], sizes = [2, 1, 32], strides = [1, 1, 1]} : vector<2x8x32xf32> to vector<2x1x32xf32>
    %165 = vector.shape_cast %164 : vector<2x1x32xf32> to vector<2x32xf32>
    %166 = vector.extract_strided_slice %159 {offsets = [0, 3, 0], sizes = [2, 1, 32], strides = [1, 1, 1]} : vector<2x8x32xf32> to vector<2x1x32xf32>
    %167 = vector.shape_cast %166 : vector<2x1x32xf32> to vector<2x32xf32>
    %168 = vector.extract_strided_slice %159 {offsets = [0, 4, 0], sizes = [2, 1, 32], strides = [1, 1, 1]} : vector<2x8x32xf32> to vector<2x1x32xf32>
    %169 = vector.shape_cast %168 : vector<2x1x32xf32> to vector<2x32xf32>
    %170 = vector.extract_strided_slice %159 {offsets = [0, 5, 0], sizes = [2, 1, 32], strides = [1, 1, 1]} : vector<2x8x32xf32> to vector<2x1x32xf32>
    %171 = vector.shape_cast %170 : vector<2x1x32xf32> to vector<2x32xf32>
    %172 = vector.extract_strided_slice %159 {offsets = [0, 6, 0], sizes = [2, 1, 32], strides = [1, 1, 1]} : vector<2x8x32xf32> to vector<2x1x32xf32>
    %173 = vector.shape_cast %172 : vector<2x1x32xf32> to vector<2x32xf32>
    %174 = vector.extract_strided_slice %159 {offsets = [0, 7, 0], sizes = [2, 1, 32], strides = [1, 1, 1]} : vector<2x8x32xf32> to vector<2x1x32xf32>
    %175 = vector.shape_cast %174 : vector<2x1x32xf32> to vector<2x32xf32>
    %176 = tpu.concatenate %161, %163, %165, %167, %169, %171, %173, %175 in 1 : vector<2x32xf32>, vector<2x32xf32>, vector<2x32xf32>, vector<2x32xf32>, vector<2x32xf32>, vector<2x32xf32>, vector<2x32xf32>, vector<2x32xf32> -> vector<2x256xf32>
    %177 = tpu.concatenate %119, %138, %157, %176 in 0 : vector<2x256xf32>, vector<2x256xf32>, vector<2x256xf32>, vector<2x256xf32> -> vector<8x256xf32>
    %c0_37 = arith.constant 0 : index
    %c0_38 = arith.constant 0 : index
    %178 = vector.load %arg13[%c0_37, %c0_38] : memref<256x768xbf16, #tpu.memory_space<vmem>>, vector<256x768xbf16>
    %c0_39 = arith.constant 0 : index
    %c0_40 = arith.constant 0 : index
    %179 = vector.load %arg14[%c0_39, %c0_40] : memref<1x768xf32, #tpu.memory_space<vmem>>, vector<1x768xf32>
    %c0_41 = arith.constant 0 : index
    %c0_42 = arith.constant 0 : index
    %180 = vector.load %arg15[%c0_41, %c0_42] : memref<256x256xbf16, #tpu.memory_space<vmem>>, vector<256x256xbf16>
    %c0_43 = arith.constant 0 : index
    %c0_44 = arith.constant 0 : index
    %181 = vector.load %arg16[%c0_43, %c0_44] : memref<1x256xf32, #tpu.memory_space<vmem>>, vector<1x256xf32>
    %c0_45 = arith.constant 0 : index
    %c0_46 = arith.constant 0 : index
    %182 = vector.load %arg17[%c0_45, %c0_46] : memref<1x256xf32, #tpu.memory_space<vmem>>, vector<1x256xf32>
    %c0_47 = arith.constant 0 : index
    %c0_48 = arith.constant 0 : index
    %183 = vector.load %arg18[%c0_47, %c0_48] : memref<1x256xf32, #tpu.memory_space<vmem>>, vector<1x256xf32>
    %c0_49 = arith.constant 0 : index
    %c0_50 = arith.constant 0 : index
    %184 = vector.load %arg19[%c0_49, %c0_50] : memref<256x32xf32, #tpu.memory_space<vmem>>, vector<256x32xf32>
    %c0_51 = arith.constant 0 : index
    %c0_52 = arith.constant 0 : index
    %185 = vector.load %arg20[%c0_51, %c0_52] : memref<32x256xf32, #tpu.memory_space<vmem>>, vector<32x256xf32>
    %c0_53 = arith.constant 0 : index
    %c0_54 = arith.constant 0 : index
    %186 = vector.load %arg21[%c0_53, %c0_54] : memref<256x256xf32, #tpu.memory_space<vmem>>, vector<256x256xf32>
    %187 = arith.truncf %177 : vector<8x256xf32> to vector<8x256xbf16>
    %cst_55 = arith.constant dense<0.000000e+00> : vector<8x768xf32>
    %188 = tpu.matmul %187, %178, %cst_55 {dimension_numbers = #tpu.dot_dimension_numbers<[1], [0], [0], [1], [0, 0, 1, 1], [], []>} : vector<8x256xbf16>, vector<256x768xbf16>, vector<8x768xf32> -> vector<8x768xf32>
    %189 = vector.broadcast %179 : vector<1x768xf32> to vector<8x768xf32>
    %190 = arith.addf %188, %189 : vector<8x768xf32>
    %191 = vector.extract_strided_slice %190 {offsets = [0, 0], sizes = [8, 256], strides = [1, 1]} : vector<8x768xf32> to vector<8x256xf32>
    %cst_56 = arith.constant 0.353553385 : f32
    %192 = vector.broadcast %cst_56 : f32 to vector<8x256xf32>
    %193 = arith.mulf %191, %192 : vector<8x256xf32>
    %194 = vector.extract_strided_slice %190 {offsets = [0, 256], sizes = [8, 256], strides = [1, 1]} : vector<8x768xf32> to vector<8x256xf32>
    %195 = vector.extract_strided_slice %190 {offsets = [0, 512], sizes = [8, 256], strides = [1, 1]} : vector<8x768xf32> to vector<8x256xf32>
    %196 = arith.mulf %193, %194 : vector<8x256xf32>
    %cst_57 = arith.constant dense<0.000000e+00> : vector<8x32xf32>
    %197 = tpu.matmul %196, %184, %cst_57 {dimension_numbers = #tpu.dot_dimension_numbers<[1], [0], [0], [1], [0, 0, 1, 1], [], []>} : vector<8x256xf32>, vector<256x32xf32>, vector<8x32xf32> -> vector<8x32xf32>
    %198 = vector.extract_strided_slice %194 {offsets = [0, 32], sizes = [8, 224], strides = [1, 1]} : vector<8x256xf32> to vector<8x224xf32>
    %199 = vector.extract_strided_slice %194 {offsets = [0, 0], sizes = [8, 32], strides = [1, 1]} : vector<8x256xf32> to vector<8x32xf32>
    %200 = tpu.concatenate %198, %199 in 1 : vector<8x224xf32>, vector<8x32xf32> -> vector<8x256xf32>
    %201 = arith.mulf %193, %200 : vector<8x256xf32>
    %cst_58 = arith.constant dense<0.000000e+00> : vector<8x32xf32>
    %202 = tpu.matmul %201, %184, %cst_58 {dimension_numbers = #tpu.dot_dimension_numbers<[1], [0], [0], [1], [0, 0, 1, 1], [], []>} : vector<8x256xf32>, vector<256x32xf32>, vector<8x32xf32> -> vector<8x32xf32>
    %203 = vector.extract_strided_slice %194 {offsets = [0, 64], sizes = [8, 192], strides = [1, 1]} : vector<8x256xf32> to vector<8x192xf32>
    %204 = vector.extract_strided_slice %194 {offsets = [0, 0], sizes = [8, 64], strides = [1, 1]} : vector<8x256xf32> to vector<8x64xf32>
    %205 = tpu.concatenate %203, %204 in 1 : vector<8x192xf32>, vector<8x64xf32> -> vector<8x256xf32>
    %206 = arith.mulf %193, %205 : vector<8x256xf32>
    %cst_59 = arith.constant dense<0.000000e+00> : vector<8x32xf32>
    %207 = tpu.matmul %206, %184, %cst_59 {dimension_numbers = #tpu.dot_dimension_numbers<[1], [0], [0], [1], [0, 0, 1, 1], [], []>} : vector<8x256xf32>, vector<256x32xf32>, vector<8x32xf32> -> vector<8x32xf32>
    %208 = vector.extract_strided_slice %194 {offsets = [0, 96], sizes = [8, 160], strides = [1, 1]} : vector<8x256xf32> to vector<8x160xf32>
    %209 = vector.extract_strided_slice %194 {offsets = [0, 0], sizes = [8, 96], strides = [1, 1]} : vector<8x256xf32> to vector<8x96xf32>
    %210 = tpu.concatenate %208, %209 in 1 : vector<8x160xf32>, vector<8x96xf32> -> vector<8x256xf32>
    %211 = arith.mulf %193, %210 : vector<8x256xf32>
    %cst_60 = arith.constant dense<0.000000e+00> : vector<8x32xf32>
    %212 = tpu.matmul %211, %184, %cst_60 {dimension_numbers = #tpu.dot_dimension_numbers<[1], [0], [0], [1], [0, 0, 1, 1], [], []>} : vector<8x256xf32>, vector<256x32xf32>, vector<8x32xf32> -> vector<8x32xf32>
    %213 = vector.extract_strided_slice %194 {offsets = [0, 128], sizes = [8, 128], strides = [1, 1]} : vector<8x256xf32> to vector<8x128xf32>
    %214 = vector.extract_strided_slice %194 {offsets = [0, 0], sizes = [8, 128], strides = [1, 1]} : vector<8x256xf32> to vector<8x128xf32>
    %215 = tpu.concatenate %213, %214 in 1 : vector<8x128xf32>, vector<8x128xf32> -> vector<8x256xf32>
    %216 = arith.mulf %193, %215 : vector<8x256xf32>
    %cst_61 = arith.constant dense<0.000000e+00> : vector<8x32xf32>
    %217 = tpu.matmul %216, %184, %cst_61 {dimension_numbers = #tpu.dot_dimension_numbers<[1], [0], [0], [1], [0, 0, 1, 1], [], []>} : vector<8x256xf32>, vector<256x32xf32>, vector<8x32xf32> -> vector<8x32xf32>
    %218 = vector.extract_strided_slice %194 {offsets = [0, 160], sizes = [8, 96], strides = [1, 1]} : vector<8x256xf32> to vector<8x96xf32>
    %219 = vector.extract_strided_slice %194 {offsets = [0, 0], sizes = [8, 160], strides = [1, 1]} : vector<8x256xf32> to vector<8x160xf32>
    %220 = tpu.concatenate %218, %219 in 1 : vector<8x96xf32>, vector<8x160xf32> -> vector<8x256xf32>
    %221 = arith.mulf %193, %220 : vector<8x256xf32>
    %cst_62 = arith.constant dense<0.000000e+00> : vector<8x32xf32>
    %222 = tpu.matmul %221, %184, %cst_62 {dimension_numbers = #tpu.dot_dimension_numbers<[1], [0], [0], [1], [0, 0, 1, 1], [], []>} : vector<8x256xf32>, vector<256x32xf32>, vector<8x32xf32> -> vector<8x32xf32>
    %223 = vector.extract_strided_slice %194 {offsets = [0, 192], sizes = [8, 64], strides = [1, 1]} : vector<8x256xf32> to vector<8x64xf32>
    %224 = vector.extract_strided_slice %194 {offsets = [0, 0], sizes = [8, 192], strides = [1, 1]} : vector<8x256xf32> to vector<8x192xf32>
    %225 = tpu.concatenate %223, %224 in 1 : vector<8x64xf32>, vector<8x192xf32> -> vector<8x256xf32>
    %226 = arith.mulf %193, %225 : vector<8x256xf32>
    %cst_63 = arith.constant dense<0.000000e+00> : vector<8x32xf32>
    %227 = tpu.matmul %226, %184, %cst_63 {dimension_numbers = #tpu.dot_dimension_numbers<[1], [0], [0], [1], [0, 0, 1, 1], [], []>} : vector<8x256xf32>, vector<256x32xf32>, vector<8x32xf32> -> vector<8x32xf32>
    %228 = vector.extract_strided_slice %194 {offsets = [0, 224], sizes = [8, 32], strides = [1, 1]} : vector<8x256xf32> to vector<8x32xf32>
    %229 = vector.extract_strided_slice %194 {offsets = [0, 0], sizes = [8, 224], strides = [1, 1]} : vector<8x256xf32> to vector<8x224xf32>
    %230 = tpu.concatenate %228, %229 in 1 : vector<8x32xf32>, vector<8x224xf32> -> vector<8x256xf32>
    %231 = arith.mulf %193, %230 : vector<8x256xf32>
    %cst_64 = arith.constant dense<0.000000e+00> : vector<8x32xf32>
    %232 = tpu.matmul %231, %184, %cst_64 {dimension_numbers = #tpu.dot_dimension_numbers<[1], [0], [0], [1], [0, 0, 1, 1], [], []>} : vector<8x256xf32>, vector<256x32xf32>, vector<8x32xf32> -> vector<8x32xf32>
    %233 = arith.maximumf %197, %202 : vector<8x32xf32>
    %234 = arith.maximumf %233, %207 : vector<8x32xf32>
    %235 = arith.maximumf %234, %212 : vector<8x32xf32>
    %236 = arith.maximumf %235, %217 : vector<8x32xf32>
    %237 = arith.maximumf %236, %222 : vector<8x32xf32>
    %238 = arith.maximumf %237, %227 : vector<8x32xf32>
    %239 = arith.maximumf %238, %232 : vector<8x32xf32>
    %240 = arith.subf %197, %239 : vector<8x32xf32>
    %241 = math.exp %240 : vector<8x32xf32>
    %242 = arith.subf %202, %239 : vector<8x32xf32>
    %243 = math.exp %242 : vector<8x32xf32>
    %244 = arith.subf %207, %239 : vector<8x32xf32>
    %245 = math.exp %244 : vector<8x32xf32>
    %246 = arith.subf %212, %239 : vector<8x32xf32>
    %247 = math.exp %246 : vector<8x32xf32>
    %248 = arith.subf %217, %239 : vector<8x32xf32>
    %249 = math.exp %248 : vector<8x32xf32>
    %250 = arith.subf %222, %239 : vector<8x32xf32>
    %251 = math.exp %250 : vector<8x32xf32>
    %252 = arith.subf %227, %239 : vector<8x32xf32>
    %253 = math.exp %252 : vector<8x32xf32>
    %254 = arith.subf %232, %239 : vector<8x32xf32>
    %255 = math.exp %254 : vector<8x32xf32>
    %256 = arith.addf %241, %243 : vector<8x32xf32>
    %257 = arith.addf %256, %245 : vector<8x32xf32>
    %258 = arith.addf %257, %247 : vector<8x32xf32>
    %259 = arith.addf %258, %249 : vector<8x32xf32>
    %260 = arith.addf %259, %251 : vector<8x32xf32>
    %261 = arith.addf %260, %253 : vector<8x32xf32>
    %262 = arith.addf %261, %255 : vector<8x32xf32>
    %263 = tpu.reciprocal %262 {approx = true} : vector<8x32xf32> -> vector<8x32xf32>
    %264 = arith.mulf %241, %263 : vector<8x32xf32>
    %cst_65 = arith.constant dense<0.000000e+00> : vector<8x256xf32>
    %265 = tpu.matmul %264, %185, %cst_65 {dimension_numbers = #tpu.dot_dimension_numbers<[1], [0], [0], [1], [0, 0, 1, 1], [], []>} : vector<8x32xf32>, vector<32x256xf32>, vector<8x256xf32> -> vector<8x256xf32>
    %266 = arith.mulf %265, %195 : vector<8x256xf32>
    %267 = arith.mulf %243, %263 : vector<8x32xf32>
    %cst_66 = arith.constant dense<0.000000e+00> : vector<8x256xf32>
    %268 = tpu.matmul %267, %185, %cst_66 {dimension_numbers = #tpu.dot_dimension_numbers<[1], [0], [0], [1], [0, 0, 1, 1], [], []>} : vector<8x32xf32>, vector<32x256xf32>, vector<8x256xf32> -> vector<8x256xf32>
    %269 = vector.extract_strided_slice %195 {offsets = [0, 32], sizes = [8, 224], strides = [1, 1]} : vector<8x256xf32> to vector<8x224xf32>
    %270 = vector.extract_strided_slice %195 {offsets = [0, 0], sizes = [8, 32], strides = [1, 1]} : vector<8x256xf32> to vector<8x32xf32>
    %271 = tpu.concatenate %269, %270 in 1 : vector<8x224xf32>, vector<8x32xf32> -> vector<8x256xf32>
    %272 = arith.mulf %268, %271 : vector<8x256xf32>
    %273 = arith.addf %266, %272 : vector<8x256xf32>
    %274 = arith.mulf %245, %263 : vector<8x32xf32>
    %cst_67 = arith.constant dense<0.000000e+00> : vector<8x256xf32>
    %275 = tpu.matmul %274, %185, %cst_67 {dimension_numbers = #tpu.dot_dimension_numbers<[1], [0], [0], [1], [0, 0, 1, 1], [], []>} : vector<8x32xf32>, vector<32x256xf32>, vector<8x256xf32> -> vector<8x256xf32>
    %276 = vector.extract_strided_slice %195 {offsets = [0, 64], sizes = [8, 192], strides = [1, 1]} : vector<8x256xf32> to vector<8x192xf32>
    %277 = vector.extract_strided_slice %195 {offsets = [0, 0], sizes = [8, 64], strides = [1, 1]} : vector<8x256xf32> to vector<8x64xf32>
    %278 = tpu.concatenate %276, %277 in 1 : vector<8x192xf32>, vector<8x64xf32> -> vector<8x256xf32>
    %279 = arith.mulf %275, %278 : vector<8x256xf32>
    %280 = arith.addf %273, %279 : vector<8x256xf32>
    %281 = arith.mulf %247, %263 : vector<8x32xf32>
    %cst_68 = arith.constant dense<0.000000e+00> : vector<8x256xf32>
    %282 = tpu.matmul %281, %185, %cst_68 {dimension_numbers = #tpu.dot_dimension_numbers<[1], [0], [0], [1], [0, 0, 1, 1], [], []>} : vector<8x32xf32>, vector<32x256xf32>, vector<8x256xf32> -> vector<8x256xf32>
    %283 = vector.extract_strided_slice %195 {offsets = [0, 96], sizes = [8, 160], strides = [1, 1]} : vector<8x256xf32> to vector<8x160xf32>
    %284 = vector.extract_strided_slice %195 {offsets = [0, 0], sizes = [8, 96], strides = [1, 1]} : vector<8x256xf32> to vector<8x96xf32>
    %285 = tpu.concatenate %283, %284 in 1 : vector<8x160xf32>, vector<8x96xf32> -> vector<8x256xf32>
    %286 = arith.mulf %282, %285 : vector<8x256xf32>
    %287 = arith.addf %280, %286 : vector<8x256xf32>
    %288 = arith.mulf %249, %263 : vector<8x32xf32>
    %cst_69 = arith.constant dense<0.000000e+00> : vector<8x256xf32>
    %289 = tpu.matmul %288, %185, %cst_69 {dimension_numbers = #tpu.dot_dimension_numbers<[1], [0], [0], [1], [0, 0, 1, 1], [], []>} : vector<8x32xf32>, vector<32x256xf32>, vector<8x256xf32> -> vector<8x256xf32>
    %290 = vector.extract_strided_slice %195 {offsets = [0, 128], sizes = [8, 128], strides = [1, 1]} : vector<8x256xf32> to vector<8x128xf32>
    %291 = vector.extract_strided_slice %195 {offsets = [0, 0], sizes = [8, 128], strides = [1, 1]} : vector<8x256xf32> to vector<8x128xf32>
    %292 = tpu.concatenate %290, %291 in 1 : vector<8x128xf32>, vector<8x128xf32> -> vector<8x256xf32>
    %293 = arith.mulf %289, %292 : vector<8x256xf32>
    %294 = arith.addf %287, %293 : vector<8x256xf32>
    %295 = arith.mulf %251, %263 : vector<8x32xf32>
    %cst_70 = arith.constant dense<0.000000e+00> : vector<8x256xf32>
    %296 = tpu.matmul %295, %185, %cst_70 {dimension_numbers = #tpu.dot_dimension_numbers<[1], [0], [0], [1], [0, 0, 1, 1], [], []>} : vector<8x32xf32>, vector<32x256xf32>, vector<8x256xf32> -> vector<8x256xf32>
    %297 = vector.extract_strided_slice %195 {offsets = [0, 160], sizes = [8, 96], strides = [1, 1]} : vector<8x256xf32> to vector<8x96xf32>
    %298 = vector.extract_strided_slice %195 {offsets = [0, 0], sizes = [8, 160], strides = [1, 1]} : vector<8x256xf32> to vector<8x160xf32>
    %299 = tpu.concatenate %297, %298 in 1 : vector<8x96xf32>, vector<8x160xf32> -> vector<8x256xf32>
    %300 = arith.mulf %296, %299 : vector<8x256xf32>
    %301 = arith.addf %294, %300 : vector<8x256xf32>
    %302 = arith.mulf %253, %263 : vector<8x32xf32>
    %cst_71 = arith.constant dense<0.000000e+00> : vector<8x256xf32>
    %303 = tpu.matmul %302, %185, %cst_71 {dimension_numbers = #tpu.dot_dimension_numbers<[1], [0], [0], [1], [0, 0, 1, 1], [], []>} : vector<8x32xf32>, vector<32x256xf32>, vector<8x256xf32> -> vector<8x256xf32>
    %304 = vector.extract_strided_slice %195 {offsets = [0, 192], sizes = [8, 64], strides = [1, 1]} : vector<8x256xf32> to vector<8x64xf32>
    %305 = vector.extract_strided_slice %195 {offsets = [0, 0], sizes = [8, 192], strides = [1, 1]} : vector<8x256xf32> to vector<8x192xf32>
    %306 = tpu.concatenate %304, %305 in 1 : vector<8x64xf32>, vector<8x192xf32> -> vector<8x256xf32>
    %307 = arith.mulf %303, %306 : vector<8x256xf32>
    %308 = arith.addf %301, %307 : vector<8x256xf32>
    %309 = arith.mulf %255, %263 : vector<8x32xf32>
    %cst_72 = arith.constant dense<0.000000e+00> : vector<8x256xf32>
    %310 = tpu.matmul %309, %185, %cst_72 {dimension_numbers = #tpu.dot_dimension_numbers<[1], [0], [0], [1], [0, 0, 1, 1], [], []>} : vector<8x32xf32>, vector<32x256xf32>, vector<8x256xf32> -> vector<8x256xf32>
    %311 = vector.extract_strided_slice %195 {offsets = [0, 224], sizes = [8, 32], strides = [1, 1]} : vector<8x256xf32> to vector<8x32xf32>
    %312 = vector.extract_strided_slice %195 {offsets = [0, 0], sizes = [8, 224], strides = [1, 1]} : vector<8x256xf32> to vector<8x224xf32>
    %313 = tpu.concatenate %311, %312 in 1 : vector<8x32xf32>, vector<8x224xf32> -> vector<8x256xf32>
    %314 = arith.mulf %310, %313 : vector<8x256xf32>
    %315 = arith.addf %308, %314 : vector<8x256xf32>
    %316 = arith.truncf %315 : vector<8x256xf32> to vector<8x256xbf16>
    %cst_73 = arith.constant dense<0.000000e+00> : vector<8x256xf32>
    %317 = tpu.matmul %316, %180, %cst_73 {dimension_numbers = #tpu.dot_dimension_numbers<[1], [0], [0], [1], [0, 0, 1, 1], [], []>} : vector<8x256xbf16>, vector<256x256xbf16>, vector<8x256xf32> -> vector<8x256xf32>
    %318 = vector.broadcast %181 : vector<1x256xf32> to vector<8x256xf32>
    %319 = arith.addf %317, %318 : vector<8x256xf32>
    %320 = arith.addf %177, %319 : vector<8x256xf32>
    %cst_74 = arith.constant dense<0.000000e+00> : vector<8x256xf32>
    %321 = tpu.matmul %320, %186, %cst_74 {dimension_numbers = #tpu.dot_dimension_numbers<[1], [0], [0], [1], [0, 0, 1, 1], [], []>} : vector<8x256xf32>, vector<256x256xf32>, vector<8x256xf32> -> vector<8x256xf32>
    %322 = arith.subf %320, %321 : vector<8x256xf32>
    %323 = arith.mulf %322, %322 : vector<8x256xf32>
    %cst_75 = arith.constant dense<0.000000e+00> : vector<8x256xf32>
    %324 = tpu.matmul %323, %186, %cst_75 {dimension_numbers = #tpu.dot_dimension_numbers<[1], [0], [0], [1], [0, 0, 1, 1], [], []>} : vector<8x256xf32>, vector<256x256xf32>, vector<8x256xf32> -> vector<8x256xf32>
    %cst_76 = arith.constant 9.99999974E-6 : f32
    %325 = vector.broadcast %cst_76 : f32 to vector<8x256xf32>
    %326 = arith.addf %324, %325 : vector<8x256xf32>
    %327 = math.rsqrt %326 : vector<8x256xf32>
    %328 = arith.mulf %322, %327 : vector<8x256xf32>
    %329 = vector.broadcast %182 : vector<1x256xf32> to vector<8x256xf32>
    %330 = arith.mulf %328, %329 : vector<8x256xf32>
    %331 = vector.broadcast %183 : vector<1x256xf32> to vector<8x256xf32>
    %332 = arith.addf %330, %331 : vector<8x256xf32>
    %333 = vector.extract_strided_slice %332 {offsets = [0, 0], sizes = [2, 256], strides = [1, 1]} : vector<8x256xf32> to vector<2x256xf32>
    %334 = vector.extract_strided_slice %332 {offsets = [2, 0], sizes = [2, 256], strides = [1, 1]} : vector<8x256xf32> to vector<2x256xf32>
    %335 = vector.extract_strided_slice %332 {offsets = [4, 0], sizes = [2, 256], strides = [1, 1]} : vector<8x256xf32> to vector<2x256xf32>
    %336 = vector.extract_strided_slice %332 {offsets = [6, 0], sizes = [2, 256], strides = [1, 1]} : vector<8x256xf32> to vector<2x256xf32>
    %337 = tpu.concatenate %333, %334, %335, %336 in 1 : vector<2x256xf32>, vector<2x256xf32>, vector<2x256xf32>, vector<2x256xf32> -> vector<2x1024xf32>
    %338 = arith.truncf %337 : vector<2x1024xf32> to vector<2x1024xbf16>
    %c0_77 = arith.constant 0 : index
    %c0_78 = arith.constant 0 : index
    %339 = vector.load %arg22[%c0_77, %c0_78] : memref<1024x256xbf16, #tpu.memory_space<vmem>>, vector<1024x256xbf16>
    %cst_79 = arith.constant dense<0.000000e+00> : vector<2x256xf32>
    %340 = tpu.matmul %338, %339, %cst_79 {dimension_numbers = #tpu.dot_dimension_numbers<[1], [0], [0], [1], [0, 0, 1, 1], [], []>} : vector<2x1024xbf16>, vector<1024x256xbf16>, vector<2x256xf32> -> vector<2x256xf32>
    %c0_80 = arith.constant 0 : index
    %c0_81 = arith.constant 0 : index
    %341 = vector.load %arg23[%c0_80, %c0_81] : memref<1x256xf32, #tpu.memory_space<vmem>>, vector<1x256xf32>
    %342 = vector.broadcast %341 : vector<1x256xf32> to vector<2x256xf32>
    %343 = arith.addf %340, %342 : vector<2x256xf32>
    %c0_82 = arith.constant 0 : index
    %c0_83 = arith.constant 0 : index
    %344 = vector.load %arg24[%c0_82, %c0_83] : memref<2x256xf32, #tpu.memory_space<vmem>>, vector<2x256xf32>
    tpu.vector_store %arg24[%c0_82, %c0_83], %343 {strides = array<i32>} : memref<2x256xf32, #tpu.memory_space<vmem>>, vector<2x256xf32>,
    return
  }
  func.func @transform_0(%arg0: i32) -> (i32, i32) {
    %c0_i32 = arith.constant 0 : i32
    %c0_i32_0 = arith.constant 0 : i32
    return %arg0, %c0_i32 : i32, i32
  }
  func.func @transform_1(%arg0: i32) -> (i32, i32) {
    %c0_i32 = arith.constant 0 : i32
    %c0_i32_0 = arith.constant 0 : i32
    %c0_i32_1 = arith.constant 0 : i32
    return %c0_i32, %c0_i32_0 : i32, i32
  }
  func.func @transform_2(%arg0: i32) -> (i32, i32) {
    %c0_i32 = arith.constant 0 : i32
    %c0_i32_0 = arith.constant 0 : i32
    %c0_i32_1 = arith.constant 0 : i32
    return %c0_i32, %c0_i32_0 : i32, i32
  }
  func.func @transform_3(%arg0: i32) -> (i32, i32) {
    %c0_i32 = arith.constant 0 : i32
    %c0_i32_0 = arith.constant 0 : i32
    %c0_i32_1 = arith.constant 0 : i32
    return %c0_i32, %c0_i32_0 : i32, i32
  }
  func.func @transform_4(%arg0: i32) -> (i32, i32) {
    %c0_i32 = arith.constant 0 : i32
    %c0_i32_0 = arith.constant 0 : i32
    %c0_i32_1 = arith.constant 0 : i32
    return %c0_i32, %c0_i32_0 : i32, i32
  }
  func.func @transform_5(%arg0: i32) -> (i32, i32) {
    %c0_i32 = arith.constant 0 : i32
    %c0_i32_0 = arith.constant 0 : i32
    %c0_i32_1 = arith.constant 0 : i32
    return %c0_i32, %c0_i32_0 : i32, i32
  }
  func.func @transform_6(%arg0: i32) -> (i32, i32) {
    %c0_i32 = arith.constant 0 : i32
    %c0_i32_0 = arith.constant 0 : i32
    %c0_i32_1 = arith.constant 0 : i32
    return %c0_i32, %c0_i32_0 : i32, i32
  }
  func.func @transform_7(%arg0: i32) -> (i32, i32) {
    %c0_i32 = arith.constant 0 : i32
    %c0_i32_0 = arith.constant 0 : i32
    %c0_i32_1 = arith.constant 0 : i32
    return %c0_i32, %c0_i32_0 : i32, i32
  }
  func.func @transform_8(%arg0: i32) -> (i32, i32) {
    %c0_i32 = arith.constant 0 : i32
    %c0_i32_0 = arith.constant 0 : i32
    %c0_i32_1 = arith.constant 0 : i32
    return %c0_i32, %c0_i32_0 : i32, i32
  }
  func.func @transform_9(%arg0: i32) -> (i32, i32) {
    %c0_i32 = arith.constant 0 : i32
    %c0_i32_0 = arith.constant 0 : i32
    %c0_i32_1 = arith.constant 0 : i32
    return %c0_i32, %c0_i32_0 : i32, i32
  }
  func.func @transform_10(%arg0: i32) -> (i32, i32) {
    %c0_i32 = arith.constant 0 : i32
    %c0_i32_0 = arith.constant 0 : i32
    %c0_i32_1 = arith.constant 0 : i32
    return %c0_i32, %c0_i32_0 : i32, i32
  }
  func.func @transform_11(%arg0: i32) -> (i32, i32) {
    %c0_i32 = arith.constant 0 : i32
    %c0_i32_0 = arith.constant 0 : i32
    %c0_i32_1 = arith.constant 0 : i32
    return %c0_i32, %c0_i32_0 : i32, i32
  }
  func.func @transform_12(%arg0: i32) -> (i32, i32) {
    %c0_i32 = arith.constant 0 : i32
    %c0_i32_0 = arith.constant 0 : i32
    %c0_i32_1 = arith.constant 0 : i32
    return %c0_i32, %c0_i32_0 : i32, i32
  }
  func.func @transform_13(%arg0: i32) -> (i32, i32) {
    %c0_i32 = arith.constant 0 : i32
    %c0_i32_0 = arith.constant 0 : i32
    %c0_i32_1 = arith.constant 0 : i32
    return %c0_i32, %c0_i32_0 : i32, i32
  }
  func.func @transform_14(%arg0: i32) -> (i32, i32) {
    %c0_i32 = arith.constant 0 : i32
    %c0_i32_0 = arith.constant 0 : i32
    %c0_i32_1 = arith.constant 0 : i32
    return %c0_i32, %c0_i32_0 : i32, i32
  }
  func.func @transform_15(%arg0: i32) -> (i32, i32) {
    %c0_i32 = arith.constant 0 : i32
    %c0_i32_0 = arith.constant 0 : i32
    %c0_i32_1 = arith.constant 0 : i32
    return %c0_i32, %c0_i32_0 : i32, i32
  }
  func.func @transform_16(%arg0: i32) -> (i32, i32) {
    %c0_i32 = arith.constant 0 : i32
    %c0_i32_0 = arith.constant 0 : i32
    %c0_i32_1 = arith.constant 0 : i32
    return %c0_i32, %c0_i32_0 : i32, i32
  }
  func.func @transform_17(%arg0: i32) -> (i32, i32) {
    %c0_i32 = arith.constant 0 : i32
    %c0_i32_0 = arith.constant 0 : i32
    %c0_i32_1 = arith.constant 0 : i32
    return %c0_i32, %c0_i32_0 : i32, i32
  }
  func.func @transform_18(%arg0: i32) -> (i32, i32) {
    %c0_i32 = arith.constant 0 : i32
    %c0_i32_0 = arith.constant 0 : i32
    %c0_i32_1 = arith.constant 0 : i32
    return %c0_i32, %c0_i32_0 : i32, i32
  }
  func.func @transform_19(%arg0: i32) -> (i32, i32) {
    %c0_i32 = arith.constant 0 : i32
    %c0_i32_0 = arith.constant 0 : i32
    %c0_i32_1 = arith.constant 0 : i32
    return %c0_i32, %c0_i32_0 : i32, i32
  }
  func.func @transform_20(%arg0: i32) -> (i32, i32) {
    %c0_i32 = arith.constant 0 : i32
    %c0_i32_0 = arith.constant 0 : i32
    %c0_i32_1 = arith.constant 0 : i32
    return %c0_i32, %c0_i32_0 : i32, i32
  }
  func.func @transform_21(%arg0: i32) -> (i32, i32) {
    %c0_i32 = arith.constant 0 : i32
    %c0_i32_0 = arith.constant 0 : i32
    %c0_i32_1 = arith.constant 0 : i32
    return %c0_i32, %c0_i32_0 : i32, i32
  }
  func.func @transform_22(%arg0: i32) -> (i32, i32) {
    %c0_i32 = arith.constant 0 : i32
    %c0_i32_0 = arith.constant 0 : i32
    %c0_i32_1 = arith.constant 0 : i32
    return %c0_i32, %c0_i32_0 : i32, i32
  }
  func.func @transform_23(%arg0: i32) -> (i32, i32) {
    %c0_i32 = arith.constant 0 : i32
    %c0_i32_0 = arith.constant 0 : i32
    return %arg0, %c0_i32 : i32, i32
  }
}

</mosaic_0001>

<bundles_post_ra>
// kernel: tile.94
= control target key start
LH: loop header
LB: loop body
LE: loop exit
PB: predicated region body
PF: predicated region fallthrough
CT: control target
= control target key end

     0   :  { %s7_s6 = smov 3  ;;  %s14_s9 = smov 3  ;;  %vm4_vm0 = vcmask 261120   ;;  %vm11_vm1 = vcmask 1048320   ;;  %vm18_vm2 = vcmask 785920   ;;  %vm25_vm3 = vcmask 523520   ;;  %s67_s0 = inlined_call_operand.vmem [shape: f32[8,32], index: 0, kind: input, shape index: {}]   ;;  %s68_s1 = inlined_call_operand.vmem [shape: f32[256], index: 1, kind: output, shape index: {}]  }
   0x1   :  { %v33_v0 = vld [vmem:[%s67_s0 + $0x3] ss:$4 sm:%s7_s6]   ;;  %s39_s10 = smov 96   ;;  %s21_s11 = smov 3  ;;  %v34_v1 = vld [vmem:[%s67_s0 + $0x2] ss:$4 sm:%s14_s9]  }
   0x2   :  { %9 = vrot.lane.b32.xlu0 %v33_v0, %s39_s10  ;;  %v35_v2 = vld [vmem:[%s67_s0 + $0x1] ss:$4 sm:%s21_s11]   ;;  %s2_s16 = smov 3  ;;  %s40_s17 = smov 32  }
   0x3   :  { %23 = vrot.lane.b32.xlu1 %v35_v2, %s40_s17  ;;  %v3_v3 = vld [vmem:[%s67_s0] ss:$4 sm:%s2_s16]   ;;  %s41_s0 = smov 64  }
   0x4   :  { %5 = vst.msk [vmem:[#allocation0] sm:$0x3] %vm4_vm0, %v3_v3  }
   0x6   :  { %16 = vrot.lane.b32.xlu0 %v34_v1, %s41_s0 }
  0x74   :  { %v10_v4 = vpop.permute.xlu0 %9  }
  0x75   :  { %12 = vst.msk [vmem:[#allocation0] sm:$0x3] %vm11_vm1, %v10_v4   ;;  %v24_v5 = vpop.permute.xlu1 %23  }
  0x78   :  { %v17_v6 = vpop.permute.xlu0 %16  }
  0x79   :  { %19 = vst.msk [vmem:[#allocation0] sm:$0x3] %vm18_vm2, %v17_v6  }
  0x7a   :  { %26 = vst.msk [vmem:[#allocation0] sm:$0x3] %vm25_vm3, %v24_v5  }
  0x81   :  { %v30_v7 = vld [vmem:[#allocation0] sm:$0x3] }
  0x82   :  { %32 = vst [vmem:[%s68_s1] sm:$0x3] %v30_v7 }

// kernel: tile.93
= control target key start
LH: loop header
LB: loop body
LE: loop exit
PB: predicated region body
PF: predicated region fallthrough
CT: control target
= control target key end

     0   :  { %s22_s0 = inlined_call_operand.vmem [shape: f32[32], index: 0, kind: input, shape index: {}]   ;;  %s23_s1 = inlined_call_operand.vmem [shape: f32[8,32], index: 1, kind: output, shape index: {}]  }
   0x1   :  { %v4_v0 = vld [vmem:[%s22_s0] ss:$0 sm:$0xff] }
   0x2   :  { %5 = vst [vmem:[%s23_s1] sm:$0xff] %v4_v0 }

// kernel: tile.66
= control target key start
LH: loop header
LB: loop body
LE: loop exit
PB: predicated region body
PF: predicated region fallthrough
CT: control target
= control target key end

     0   :  { %s22_s0 = inlined_call_operand.vmem [shape: f32[32], index: 0, kind: input, shape index: {}]   ;;  %s23_s1 = inlined_call_operand.vmem [shape: f32[4,32], index: 1, kind: output, shape index: {}]  }
   0x1   :  { %v4_v0 = vld [vmem:[%s22_s0] ss:$0 sm:$0xff] }
   0x2   :  { %5 = vst [vmem:[%s23_s1] sm:$0xf] %v4_v0 }

// kernel: tile.67
= control target key start
LH: loop header
LB: loop body
LE: loop exit
PB: predicated region body
PF: predicated region fallthrough
CT: control target
= control target key end

     0   :  { %vm7_vm0 = vcmask 261120   ;;  %s37_s8 = smov 32   ;;  %s38_s9 = smov 64   ;;  %vm13_vm1 = vcmask 1048320   ;;  %vm19_vm2 = vcmask 785920   ;;  %vm25_vm3 = vcmask 523520   ;;  %s55_s0 = inlined_call_operand.vmem [shape: f32[4,32], index: 0, kind: input, shape index: {}]   ;;  %s56_s1 = inlined_call_operand.vmem [shape: f32[128], index: 1, kind: output, shape index: {}]  }
   0x1   :  { %v4_v0 = vld [vmem:[%s55_s0] sm:$0xf]  ;;  %s36_s0 = smov 96  }
   0x2   :  { %5 = vst [vmem:[#allocation1] sm:$0xf] %v4_v0 }
   0x9   :  { %v10_v1 = vld [vmem:[#allocation1 + $0x3] sm:$0x1]   ;;  %v22_v2 = vld [vmem:[#allocation1 + $0x1] sm:$0x1]   ;;  %v6_v3 = vld [vmem:[#allocation1] sm:$0x1]  }
   0xa   :  { %11 = vrot.lane.b32.xlu0 %v10_v1, %s36_s0  ;;  %23 = vrot.lane.b32.xlu1 %v22_v2, %s37_s8  ;;  %v16_v4 = vld [vmem:[#allocation1 + $0x2] sm:$0x1]   ;;  %8 = vst.msk [vmem:[#allocation0] sm:$0x1] %vm7_vm0, %v6_v3  }
   0xe   :  { %17 = vrot.lane.b32.xlu0 %v16_v4, %s38_s9 }
  0x7c   :  { %v12_v5 = vpop.permute.xlu0 %11   ;;  %v24_v6 = vpop.permute.xlu1 %23  }
  0x7d   :  { %14 = vst.msk [vmem:[#allocation0] sm:$0x1] %vm13_vm1, %v12_v5  }
  0x80   :  { %v18_v7 = vpop.permute.xlu0 %17  }
  0x81   :  { %20 = vst.msk [vmem:[#allocation0] sm:$0x1] %vm19_vm2, %v18_v7  }
  0x82   :  { %26 = vst.msk [vmem:[#allocation0] sm:$0x1] %vm25_vm3, %v24_v6  }
  0x89   :  { %v30_v8 = vld [vmem:[#allocation0] sm:$0x1] }
  0x8a   :  { %32 = vst [vmem:[%s56_s1] sm:$0x1] %v30_v8 }

// kernel: tile.103
= control target key start
LH: loop header
LB: loop body
LE: loop exit
PB: predicated region body
PF: predicated region fallthrough
CT: control target
= control target key end

     0   :  { %s7_s6 = smov 3  ;;  %s14_s9 = smov 3  ;;  %vm4_vm0 = vcmask 261120   ;;  %vm11_vm1 = vcmask 1048320   ;;  %vm18_vm2 = vcmask 785920   ;;  %vm25_vm3 = vcmask 523520   ;;  %s76_s0 = inlined_call_operand.vmem [shape: f32[8,32], index: 0, kind: input, shape index: {}]   ;;  %s77_s1 = inlined_call_operand.vmem [shape: f32[1,256], index: 1, kind: output, shape index: {}]  }
   0x1   :  { %v38_v0 = vld [vmem:[%s76_s0 + $0x3] ss:$4 sm:%s7_s6]   ;;  %s45_s10 = smov 96   ;;  %s21_s11 = smov 3  ;;  %v39_v1 = vld [vmem:[%s76_s0 + $0x2] ss:$4 sm:%s14_s9]  }
   0x2   :  { %9 = vrot.lane.b32.xlu0 %v38_v0, %s45_s10  ;;  %v40_v2 = vld [vmem:[%s76_s0 + $0x1] ss:$4 sm:%s21_s11]   ;;  %s2_s16 = smov 3  ;;  %s46_s17 = smov 32  }
   0x3   :  { %23 = vrot.lane.b32.xlu1 %v40_v2, %s46_s17  ;;  %v3_v3 = vld [vmem:[%s76_s0] ss:$4 sm:%s2_s16]   ;;  %s47_s0 = smov 64  }
   0x4   :  { %5 = vst.msk [vmem:[#allocation0] ss:$8 sm:$0x3] %vm4_vm0, %v3_v3  }
   0x6   :  { %16 = vrot.lane.b32.xlu0 %v39_v1, %s47_s0 }
  0x74   :  { %v10_v4 = vpop.permute.xlu0 %9  }
  0x75   :  { %12 = vst.msk [vmem:[#allocation0] ss:$8 sm:$0x3] %vm11_vm1, %v10_v4   ;;  %v24_v5 = vpop.permute.xlu1 %23  }
  0x78   :  { %v17_v6 = vpop.permute.xlu0 %16  }
  0x79   :  { %19 = vst.msk [vmem:[#allocation0] ss:$8 sm:$0x3] %vm18_vm2, %v17_v6  }
  0x7a   :  { %26 = vst.msk [vmem:[#allocation0] ss:$8 sm:$0x3] %vm25_vm3, %v24_v5  }
  0x81   :  { %v30_v7 = vld [vmem:[#allocation0] sm:$0x1]  ;;  %v34_v8 = vld [vmem:[#allocation0 + $0x8] sm:$0x1] }
  0x82   :  { %32 = vst [vmem:[%s77_s1] sm:$0x1] %v30_v7  ;;  %41 = vst [vmem:[%s77_s1 + $0x1] sm:$0x1] %v34_v8 }

// kernel: tile.76
= control target key start
LH: loop header
LB: loop body
LE: loop exit
PB: predicated region body
PF: predicated region fallthrough
CT: control target
= control target key end

     0   :  { %vm7_vm0 = vcmask 261120   ;;  %s37_s8 = smov 32   ;;  %s38_s9 = smov 64   ;;  %vm13_vm1 = vcmask 1048320   ;;  %vm19_vm2 = vcmask 785920   ;;  %vm25_vm3 = vcmask 523520   ;;  %s55_s0 = inlined_call_operand.vmem [shape: f32[4,32], index: 0, kind: input, shape index: {}]   ;;  %s56_s1 = inlined_call_operand.vmem [shape: f32[1,128], index: 1, kind: output, shape index: {}]  }
   0x1   :  { %v4_v0 = vld [vmem:[%s55_s0] sm:$0xf]  ;;  %s36_s0 = smov 96  }
   0x2   :  { %5 = vst [vmem:[#allocation1] sm:$0xf] %v4_v0 }
   0x9   :  { %v10_v1 = vld [vmem:[#allocation1 + $0x3] sm:$0x1]   ;;  %v22_v2 = vld [vmem:[#allocation1 + $0x1] sm:$0x1]   ;;  %v6_v3 = vld [vmem:[#allocation1] sm:$0x1]  }
   0xa   :  { %11 = vrot.lane.b32.xlu0 %v10_v1, %s36_s0  ;;  %23 = vrot.lane.b32.xlu1 %v22_v2, %s37_s8  ;;  %v16_v4 = vld [vmem:[#allocation1 + $0x2] sm:$0x1]   ;;  %8 = vst.msk [vmem:[#allocation0] sm:$0x1] %vm7_vm0, %v6_v3  }
   0xe   :  { %17 = vrot.lane.b32.xlu0 %v16_v4, %s38_s9 }
  0x7c   :  { %v12_v5 = vpop.permute.xlu0 %11   ;;  %v24_v6 = vpop.permute.xlu1 %23  }
  0x7d   :  { %14 = vst.msk [vmem:[#allocation0] sm:$0x1] %vm13_vm1, %v12_v5  }
  0x80   :  { %v18_v7 = vpop.permute.xlu0 %17  }
  0x81   :  { %20 = vst.msk [vmem:[#allocation0] sm:$0x1] %vm19_vm2, %v18_v7  }
  0x82   :  { %26 = vst.msk [vmem:[#allocation0] sm:$0x1] %vm25_vm3, %v24_v6  }
  0x89   :  { %v30_v8 = vld [vmem:[#allocation0] sm:$0x1] }
  0x8a   :  { %32 = vst [vmem:[%s56_s1] sm:$0x1] %v30_v8 }

</bundles_post_ra>
